<compile_context>
chip_gen: v7x
topology: tpu7x:2x2x1
jax: 0.10.0
libtpu: 0.0.40
codegen_flags: <defaults>
</compile_context>

<pallas_src>
from functools import partial
import math

import jax
import jax.numpy as jnp
from jax.experimental import pallas as pl
from jax.experimental.pallas import tpu as pltpu


def _attnpool_kernel(x_ref, pos0_ref, posr_ref, wqkv_ref, bqkv_ref,
                     wc_ref, bc_ref, hsel_ref, hselT_ref, out_ref, *, scale):
    Tp = x_ref.shape[1]          # spatial tokens (mean token excluded)
    C = x_ref.shape[2]

    x = x_ref[0]                                                       # (Tp, C)

    # token 0 = spatial mean + positional-embedding row 0; rest = x + pos[1:]
    tok0 = jnp.mean(x, axis=0, keepdims=True) + pos0_ref[...]          # (1, C)
    tokr = x + posr_ref[...]                                           # (Tp, C)

    # qkv projection (1x1 conv == matmul). Only token 0 needs its query.
    qkv0 = jnp.dot(tok0, wqkv_ref[...],
                   preferred_element_type=jnp.float32) + bqkv_ref[...]     # (1, 3C)
    kv_r = jnp.dot(tokr, wqkv_ref[:, C:],
                   preferred_element_type=jnp.float32) + bqkv_ref[:, C:]   # (Tp, 2C)

    qs = qkv0[:, :C] * scale                                           # (1, C)
    k0 = qkv0[:, C:2 * C] * scale                                      # (1, C)
    v0 = qkv0[:, 2 * C:]                                               # (1, C)
    k_r = kv_r[:, :C] * scale                                          # (Tp, C)
    v_r = kv_r[:, C:]                                                  # (Tp, C)

    # per-head scores of query 0 against all Tp + 1 keys:
    #   s[t, h] = sum_{c in head h} (q0*scale)[c] * (k_t*scale)[c]
    s_r = jnp.dot(k_r * qs, hsel_ref[...],
                  preferred_element_type=jnp.float32)                  # (Tp, NH)
    s_0 = jnp.dot(k0 * qs, hsel_ref[...],
                  preferred_element_type=jnp.float32)                  # (1, NH)

    # numerically stable softmax over the Tp + 1 keys, per head
    m = jnp.maximum(jnp.max(s_r, axis=0, keepdims=True), s_0)          # (1, NH)
    e_r = jnp.exp(s_r - m)                                             # (Tp, NH)
    e_0 = jnp.exp(s_0 - m)                                             # (1, NH)
    inv = 1.0 / (jnp.sum(e_r, axis=0, keepdims=True) + e_0)            # (1, NH)
    w_r = e_r * inv
    w_0 = e_0 * inv

    # broadcast per-head weights back to channels and reduce over the keys
    wr_full = jnp.dot(w_r, hselT_ref[...],
                      preferred_element_type=jnp.float32)              # (Tp, C)
    w0_full = jnp.dot(w_0, hselT_ref[...],
                      preferred_element_type=jnp.float32)              # (1, C)
    a0 = jnp.sum(wr_full * v_r, axis=0, keepdims=True) + w0_full * v0  # (1, C)

    # output projection (1x1 conv), token 0 only
    out_ref[0] = jnp.dot(a0, wc_ref[...],
                         preferred_element_type=jnp.float32) + bc_ref[...]


def attention_pool_2d_pallas(x_nchw, pos_emb, w_qkv, b_qkv, w_c, b_c, num_heads):
    """x_nchw: (B, C, H, W) f32 -> (B, Cout) f32, matching AttentionPool2d.forward."""
    B, C, H, W = x_nchw.shape
    Tp = H * W
    Cout = w_c.shape[0]
    ch = C // num_heads
    scale = float(ch) ** -0.25

    # channels-last, lane-dense tokens: (B, HW, C)
    x_tok = jnp.transpose(x_nchw, (0, 2, 3, 1)).reshape(B, Tp, C)

    pos = pos_emb.T                                   # (Tp + 1, C)
    pos0 = pos[0:1, :]                                # (1, C)   mean-token row
    posr = pos[1:, :]                                 # (Tp, C)  spatial rows

    wqkv_t = w_qkv.T                                  # (C, 3C): [Wq | Wk | Wv] columns
    bqkv = b_qkv.reshape(1, 3 * C)
    wc_t = w_c.T                                      # (C, Cout)
    bc = b_c.reshape(1, Cout)

    # head-selector matrices: hsel[c, h] = 1 iff channel c belongs to head h
    head_of_chan = jnp.repeat(jnp.arange(num_heads), ch)
    hsel = (head_of_chan[:, None] == jnp.arange(num_heads)[None, :]).astype(jnp.float32)
    hselT = hsel.T

    def full_spec(a):
        nd = a.ndim
        return pl.BlockSpec(a.shape, lambda b, _n=nd: (0,) * _n)

    grid_spec = pltpu.PrefetchScalarGridSpec(
        num_scalar_prefetch=0,
        grid=(B,),
        in_specs=[
            pl.BlockSpec((1, Tp, C), lambda b: (b, 0, 0)),
            full_spec(pos0), full_spec(posr),
            full_spec(wqkv_t), full_spec(bqkv),
            full_spec(wc_t), full_spec(bc),
            full_spec(hsel), full_spec(hselT),
        ],
        out_specs=pl.BlockSpec((1, 1, Cout), lambda b: (b, 0, 0)),
    )

    out = pl.pallas_call(
        partial(_attnpool_kernel, scale=scale),
        out_shape=jax.ShapeDtypeStruct((B, 1, Cout), jnp.float32),
        grid_spec=grid_spec,
        compiler_params=pltpu.CompilerParams(
            dimension_semantics=("parallel",)),
    )(x_tok, pos0, posr, wqkv_t, bqkv, wc_t, bc, hsel, hselT)
    return out.reshape(B, Cout)


# ------------------------- plain-JAX reference (mirrors the PyTorch code) ----
def attention_pool_2d_ref(x_nchw, pos_emb, w_qkv, b_qkv, w_c, b_c, num_heads):
    B, C, H, W = x_nchw.shape
    x = x_nchw.reshape(B, C, H * W)
    x = jnp.concatenate([x.mean(axis=-1, keepdims=True), x], axis=-1)   # (B, C, T)
    x = x + pos_emb[None, :, :]
    qkv = jnp.einsum('oc,bct->bot', w_qkv, x) + b_qkv[None, :, None]    # (B, 3C, T)

    bs, width, length = qkv.shape
    ch = width // (3 * num_heads)
    q, k, v = jnp.split(qkv, 3, axis=1)
    scale = 1.0 / math.sqrt(math.sqrt(ch))
    q = (q * scale).reshape(bs * num_heads, ch, length)
    k = (k * scale).reshape(bs * num_heads, ch, length)
    v = v.reshape(bs * num_heads, ch, length)
    weight = jnp.einsum('bct,bcs->bts', q, k)
    weight = jax.nn.softmax(weight, axis=-1)
    a = jnp.einsum('bts,bcs->bct', weight, v).reshape(bs, -1, length)   # (B, C, T)
    out = jnp.einsum('oc,bct->bot', w_c, a) + b_c[None, :, None]        # (B, Cout, T)
    return out[:, :, 0]


if __name__ == "__main__":
    # AttentionPool2d(spacial_dim=8, embed_dim=128, num_heads_channels=32, output_dim=128)
    B = 2
    spacial_dim = 8
    embed_dim = 128
    num_heads_channels = 32
    output_dim = 128

    H = W = spacial_dim
    C = embed_dim
    num_heads = C // num_heads_channels          # 4 heads
    T = spacial_dim ** 2 + 1                     # 65 tokens (mean + 64 spatial)

    key = jax.random.PRNGKey(0)
    ks = jax.random.split(key, 6)
    x = jax.random.normal(ks[0], (B, C, H, W), jnp.float32)
    pos_emb = jax.random.normal(ks[1], (C, T), jnp.float32) / C ** 0.5
    # Conv1d(C, 3C, 1) / Conv1d(C, Cout, 1) weights with the length-1 kernel
    # axis squeezed away (the 1x1 conv is a per-token linear).
    w_qkv = 0.05 * jax.random.normal(ks[2], (3 * C, C), jnp.float32)
    b_qkv = 0.05 * jax.random.normal(ks[3], (3 * C,), jnp.float32)
    w_c = 0.05 * jax.random.normal(ks[4], (output_dim, C), jnp.float32)
    b_c = 0.05 * jax.random.normal(ks[5], (output_dim,), jnp.float32)

    out = attention_pool_2d_pallas(x, pos_emb, w_qkv, b_qkv, w_c, b_c, num_heads)
    jax.block_until_ready(out)

    ref = attention_pool_2d_ref(x, pos_emb, w_qkv, b_qkv, w_c, b_c, num_heads)
    if not jnp.allclose(out, ref, rtol=1e-3, atol=1e-4):
        err = float(jnp.max(jnp.abs(out - ref)))
        raise AssertionError(f"Pallas AttentionPool2d mismatch (max abs err {err})")
    print("KERNEL_OK")
</pallas_src>

<mosaic_0001>
module attributes {stable_mosaic.version = 11 : i64} {
  func.func @_attnpool_kernel(%arg0: i32, %arg1: memref<1x64x128xf32, #tpu.memory_space<vmem>>, %arg2: memref<1x128xf32, #tpu.memory_space<vmem>>, %arg3: memref<64x128xf32, #tpu.memory_space<vmem>>, %arg4: memref<128x384xf32, #tpu.memory_space<vmem>>, %arg5: memref<1x384xf32, #tpu.memory_space<vmem>>, %arg6: memref<128x128xf32, #tpu.memory_space<vmem>>, %arg7: memref<1x128xf32, #tpu.memory_space<vmem>>, %arg8: memref<128x4xf32, #tpu.memory_space<vmem>>, %arg9: memref<4x128xf32, #tpu.memory_space<vmem>>, %arg10: memref<1x1x128xf32, #tpu.memory_space<vmem>>) attributes {dimension_semantics = [#tpu.dimension_semantics<parallel>], iteration_bounds = array<i64: 2>, scalar_prefetch = 0 : i64, scratch_operands = 0 : i64, tpu.core_type = #tpu.core_type<tc>, window_params = [{transform_indices = @transform_0, window_bounds = array<i64: 1, 64, 128>}, {pipeline_mode = #tpu.pipeline_mode<synchronous>, transform_indices = @transform_1, window_bounds = array<i64: 1, 128>}, {pipeline_mode = #tpu.pipeline_mode<synchronous>, transform_indices = @transform_2, window_bounds = array<i64: 64, 128>}, {pipeline_mode = #tpu.pipeline_mode<synchronous>, transform_indices = @transform_3, window_bounds = array<i64: 128, 384>}, {pipeline_mode = #tpu.pipeline_mode<synchronous>, transform_indices = @transform_4, window_bounds = array<i64: 1, 384>}, {pipeline_mode = #tpu.pipeline_mode<synchronous>, transform_indices = @transform_5, window_bounds = array<i64: 128, 128>}, {pipeline_mode = #tpu.pipeline_mode<synchronous>, transform_indices = @transform_6, window_bounds = array<i64: 1, 128>}, {pipeline_mode = #tpu.pipeline_mode<synchronous>, transform_indices = @transform_7, window_bounds = array<i64: 128, 4>}, {pipeline_mode = #tpu.pipeline_mode<synchronous>, transform_indices = @transform_8, window_bounds = array<i64: 4, 128>}, {transform_indices = @transform_9, window_bounds = array<i64: 1, 1, 128>}]} {
    %c0 = arith.constant 0 : index
    %c0_0 = arith.constant 0 : index
    %c0_1 = arith.constant 0 : index
    %0 = vector.load %arg1[%c0, %c0_0, %c0_1] : memref<1x64x128xf32, #tpu.memory_space<vmem>>, vector<1x64x128xf32>
    %1 = vector.shape_cast %0 : vector<1x64x128xf32> to vector<64x128xf32>
    %cst = arith.constant dense<0.000000e+00> : vector<128xf32>
    %2 = vector.multi_reduction <add>, %1, %cst [0] : vector<64x128xf32> to vector<128xf32>
    %3 = vector.shape_cast %2 : vector<128xf32> to vector<1x128xf32>
    %cst_2 = arith.constant 6.400000e+01 : f32
    %4 = vector.broadcast %cst_2 : f32 to vector<1x128xf32>
    %5 = arith.divf %3, %4 : vector<1x128xf32>
    %c0_3 = arith.constant 0 : index
    %c0_4 = arith.constant 0 : index
    %6 = vector.load %arg2[%c0_3, %c0_4] : memref<1x128xf32, #tpu.memory_space<vmem>>, vector<1x128xf32>
    %7 = arith.addf %5, %6 : vector<1x128xf32>
    %c0_5 = arith.constant 0 : index
    %c0_6 = arith.constant 0 : index
    %8 = vector.load %arg3[%c0_5, %c0_6] : memref<64x128xf32, #tpu.memory_space<vmem>>, vector<64x128xf32>
    %9 = arith.addf %1, %8 : vector<64x128xf32>
    %c0_7 = arith.constant 0 : index
    %c0_8 = arith.constant 0 : index
    %10 = vector.load %arg4[%c0_7, %c0_8] : memref<128x384xf32, #tpu.memory_space<vmem>>, vector<128x384xf32>
    %cst_9 = arith.constant dense<0.000000e+00> : vector<1x384xf32>
    %11 = tpu.matmul %7, %10, %cst_9 {dimension_numbers = #tpu.dot_dimension_numbers<[1], [0], [0], [1], [0, 0, 1, 1], [], []>} : vector<1x128xf32>, vector<128x384xf32>, vector<1x384xf32> -> vector<1x384xf32>
    %c0_10 = arith.constant 0 : index
    %c0_11 = arith.constant 0 : index
    %12 = vector.load %arg5[%c0_10, %c0_11] : memref<1x384xf32, #tpu.memory_space<vmem>>, vector<1x384xf32>
    %13 = arith.addf %11, %12 : vector<1x384xf32>
    %c0_12 = arith.constant 0 : index
    %c128 = arith.constant 128 : index
    %14 = vector.load %arg4[%c0_12, %c128] : memref<128x384xf32, #tpu.memory_space<vmem>>, vector<128x256xf32>
    %cst_13 = arith.constant dense<0.000000e+00> : vector<64x256xf32>
    %15 = tpu.matmul %9, %14, %cst_13 {dimension_numbers = #tpu.dot_dimension_numbers<[1], [0], [0], [1], [0, 0, 1, 1], [], []>} : vector<64x128xf32>, vector<128x256xf32>, vector<64x256xf32> -> vector<64x256xf32>
    %c0_14 = arith.constant 0 : index
    %c128_15 = arith.constant 128 : index
    %16 = vector.load %arg5[%c0_14, %c128_15] : memref<1x384xf32, #tpu.memory_space<vmem>>, vector<1x256xf32>
    %17 = vector.broadcast %16 : vector<1x256xf32> to vector<64x256xf32>
    %18 = arith.addf %15, %17 : vector<64x256xf32>
    %19 = vector.extract_strided_slice %13 {offsets = [0, 0], sizes = [1, 128], strides = [1, 1]} : vector<1x384xf32> to vector<1x128xf32>
    %cst_16 = arith.constant 0.420448214 : f32
    %20 = vector.broadcast %cst_16 : f32 to vector<1x128xf32>
    %21 = arith.mulf %19, %20 : vector<1x128xf32>
    %22 = vector.extract_strided_slice %13 {offsets = [0, 128], sizes = [1, 128], strides = [1, 1]} : vector<1x384xf32> to vector<1x128xf32>
    %cst_17 = arith.constant 0.420448214 : f32
    %23 = vector.broadcast %cst_17 : f32 to vector<1x128xf32>
    %24 = arith.mulf %22, %23 : vector<1x128xf32>
    %25 = vector.extract_strided_slice %13 {offsets = [0, 256], sizes = [1, 128], strides = [1, 1]} : vector<1x384xf32> to vector<1x128xf32>
    %26 = vector.extract_strided_slice %18 {offsets = [0, 0], sizes = [64, 128], strides = [1, 1]} : vector<64x256xf32> to vector<64x128xf32>
    %cst_18 = arith.constant 0.420448214 : f32
    %27 = vector.broadcast %cst_18 : f32 to vector<64x128xf32>
    %28 = arith.mulf %26, %27 : vector<64x128xf32>
    %29 = vector.extract_strided_slice %18 {offsets = [0, 128], sizes = [64, 128], strides = [1, 1]} : vector<64x256xf32> to vector<64x128xf32>
    %30 = vector.broadcast %21 : vector<1x128xf32> to vector<64x128xf32>
    %31 = arith.mulf %28, %30 : vector<64x128xf32>
    %c0_19 = arith.constant 0 : index
    %c0_20 = arith.constant 0 : index
    %32 = vector.load %arg8[%c0_19, %c0_20] : memref<128x4xf32, #tpu.memory_space<vmem>>, vector<128x4xf32>
    %cst_21 = arith.constant dense<0.000000e+00> : vector<64x4xf32>
    %33 = tpu.matmul %31, %32, %cst_21 {dimension_numbers = #tpu.dot_dimension_numbers<[1], [0], [0], [1], [0, 0, 1, 1], [], []>} : vector<64x128xf32>, vector<128x4xf32>, vector<64x4xf32> -> vector<64x4xf32>
    %34 = arith.mulf %24, %21 : vector<1x128xf32>
    %c0_22 = arith.constant 0 : index
    %c0_23 = arith.constant 0 : index
    %35 = vector.load %arg8[%c0_22, %c0_23] : memref<128x4xf32, #tpu.memory_space<vmem>>, vector<128x4xf32>
    %cst_24 = arith.constant dense<0.000000e+00> : vector<1x4xf32>
    %36 = tpu.matmul %34, %35, %cst_24 {dimension_numbers = #tpu.dot_dimension_numbers<[1], [0], [0], [1], [0, 0, 1, 1], [], []>} : vector<1x128xf32>, vector<128x4xf32>, vector<1x4xf32> -> vector<1x4xf32>
    %cst_25 = arith.constant dense<0xFF800000> : vector<4xf32>
    %37 = vector.multi_reduction <maximumf>, %33, %cst_25 [0] : vector<64x4xf32> to vector<4xf32>
    %38 = vector.shape_cast %37 : vector<4xf32> to vector<1x4xf32>
    %39 = arith.maximumf %38, %36 : vector<1x4xf32>
    %40 = vector.broadcast %39 : vector<1x4xf32> to vector<64x4xf32>
    %41 = arith.subf %33, %40 : vector<64x4xf32>
    %42 = math.exp %41 : vector<64x4xf32>
    %43 = arith.subf %36, %39 : vector<1x4xf32>
    %44 = math.exp %43 : vector<1x4xf32>
    %cst_26 = arith.constant dense<0.000000e+00> : vector<4xf32>
    %45 = vector.multi_reduction <add>, %42, %cst_26 [0] : vector<64x4xf32> to vector<4xf32>
    %46 = vector.shape_cast %45 : vector<4xf32> to vector<1x4xf32>
    %47 = arith.addf %46, %44 : vector<1x4xf32>
    %cst_27 = arith.constant 1.000000e+00 : f32
    %48 = vector.broadcast %cst_27 : f32 to vector<1x4xf32>
    %49 = arith.divf %48, %47 : vector<1x4xf32>
    %50 = vector.broadcast %49 : vector<1x4xf32> to vector<64x4xf32>
    %51 = arith.mulf %42, %50 : vector<64x4xf32>
    %52 = arith.mulf %44, %49 : vector<1x4xf32>
    %c0_28 = arith.constant 0 : index
    %c0_29 = arith.constant 0 : index
    %53 = vector.load %arg9[%c0_28, %c0_29] : memref<4x128xf32, #tpu.memory_space<vmem>>, vector<4x128xf32>
    %cst_30 = arith.constant dense<0.000000e+00> : vector<64x128xf32>
    %54 = tpu.matmul %51, %53, %cst_30 {dimension_numbers = #tpu.dot_dimension_numbers<[1], [0], [0], [1], [0, 0, 1, 1], [], []>} : vector<64x4xf32>, vector<4x128xf32>, vector<64x128xf32> -> vector<64x128xf32>
    %c0_31 = arith.constant 0 : index
    %c0_32 = arith.constant 0 : index
    %55 = vector.load %arg9[%c0_31, %c0_32] : memref<4x128xf32, #tpu.memory_space<vmem>>, vector<4x128xf32>
    %cst_33 = arith.constant dense<0.000000e+00> : vector<1x128xf32>
    %56 = tpu.matmul %52, %55, %cst_33 {dimension_numbers = #tpu.dot_dimension_numbers<[1], [0], [0], [1], [0, 0, 1, 1], [], []>} : vector<1x4xf32>, vector<4x128xf32>, vector<1x128xf32> -> vector<1x128xf32>
    %57 = arith.mulf %54, %29 : vector<64x128xf32>
    %cst_34 = arith.constant dense<0.000000e+00> : vector<128xf32>
    %58 = vector.multi_reduction <add>, %57, %cst_34 [0] : vector<64x128xf32> to vector<128xf32>
    %59 = vector.shape_cast %58 : vector<128xf32> to vector<1x128xf32>
    %60 = arith.mulf %56, %25 : vector<1x128xf32>
    %61 = arith.addf %59, %60 : vector<1x128xf32>
    %c0_35 = arith.constant 0 : index
    %c0_36 = arith.constant 0 : index
    %62 = vector.load %arg6[%c0_35, %c0_36] : memref<128x128xf32, #tpu.memory_space<vmem>>, vector<128x128xf32>
    %cst_37 = arith.constant dense<0.000000e+00> : vector<1x128xf32>
    %63 = tpu.matmul %61, %62, %cst_37 {dimension_numbers = #tpu.dot_dimension_numbers<[1], [0], [0], [1], [0, 0, 1, 1], [], []>} : vector<1x128xf32>, vector<128x128xf32>, vector<1x128xf32> -> vector<1x128xf32>
    %c0_38 = arith.constant 0 : index
    %c0_39 = arith.constant 0 : index
    %64 = vector.load %arg7[%c0_38, %c0_39] : memref<1x128xf32, #tpu.memory_space<vmem>>, vector<1x128xf32>
    %65 = arith.addf %63, %64 : vector<1x128xf32>
    %c0_40 = arith.constant 0 : index
    %c0_41 = arith.constant 0 : index
    %c0_42 = arith.constant 0 : index
    %66 = vector.load %arg10[%c0_40, %c0_41, %c0_42] : memref<1x1x128xf32, #tpu.memory_space<vmem>>, vector<1x1x128xf32>
    %67 = vector.shape_cast %66 : vector<1x1x128xf32> to vector<1x128xf32>
    %68 = vector.shape_cast %65 : vector<1x128xf32> to vector<1x1x128xf32>
    tpu.vector_store %arg10[%c0_40, %c0_41, %c0_42], %68 {strides = array<i32>} : memref<1x1x128xf32, #tpu.memory_space<vmem>>, vector<1x1x128xf32>,
    return
  }
  func.func @transform_0(%arg0: i32) -> (i32, i32, i32) {
    %c0_i32 = arith.constant 0 : i32
    %c0_i32_0 = arith.constant 0 : i32
    %c0_i32_1 = arith.constant 0 : i32
    return %arg0, %c0_i32, %c0_i32_0 : i32, i32, i32
  }
  func.func @transform_1(%arg0: i32) -> (i32, i32) {
    %c0_i32 = arith.constant 0 : i32
    %c0_i32_0 = arith.constant 0 : i32
    %c0_i32_1 = arith.constant 0 : i32
    return %c0_i32, %c0_i32_0 : i32, i32
  }
  func.func @transform_2(%arg0: i32) -> (i32, i32) {
    %c0_i32 = arith.constant 0 : i32
    %c0_i32_0 = arith.constant 0 : i32
    %c0_i32_1 = arith.constant 0 : i32
    return %c0_i32, %c0_i32_0 : i32, i32
  }
  func.func @transform_3(%arg0: i32) -> (i32, i32) {
    %c0_i32 = arith.constant 0 : i32
    %c0_i32_0 = arith.constant 0 : i32
    %c0_i32_1 = arith.constant 0 : i32
    return %c0_i32, %c0_i32_0 : i32, i32
  }
  func.func @transform_4(%arg0: i32) -> (i32, i32) {
    %c0_i32 = arith.constant 0 : i32
    %c0_i32_0 = arith.constant 0 : i32
    %c0_i32_1 = arith.constant 0 : i32
    return %c0_i32, %c0_i32_0 : i32, i32
  }
  func.func @transform_5(%arg0: i32) -> (i32, i32) {
    %c0_i32 = arith.constant 0 : i32
    %c0_i32_0 = arith.constant 0 : i32
    %c0_i32_1 = arith.constant 0 : i32
    return %c0_i32, %c0_i32_0 : i32, i32
  }
  func.func @transform_6(%arg0: i32) -> (i32, i32) {
    %c0_i32 = arith.constant 0 : i32
    %c0_i32_0 = arith.constant 0 : i32
    %c0_i32_1 = arith.constant 0 : i32
    return %c0_i32, %c0_i32_0 : i32, i32
  }
  func.func @transform_7(%arg0: i32) -> (i32, i32) {
    %c0_i32 = arith.constant 0 : i32
    %c0_i32_0 = arith.constant 0 : i32
    %c0_i32_1 = arith.constant 0 : i32
    return %c0_i32, %c0_i32_0 : i32, i32
  }
  func.func @transform_8(%arg0: i32) -> (i32, i32) {
    %c0_i32 = arith.constant 0 : i32
    %c0_i32_0 = arith.constant 0 : i32
    %c0_i32_1 = arith.constant 0 : i32
    return %c0_i32, %c0_i32_0 : i32, i32
  }
  func.func @transform_9(%arg0: i32) -> (i32, i32, i32) {
    %c0_i32 = arith.constant 0 : i32
    %c0_i32_0 = arith.constant 0 : i32
    %c0_i32_1 = arith.constant 0 : i32
    return %arg0, %c0_i32, %c0_i32_0 : i32, i32, i32
  }
}

</mosaic_0001>

<bundles_post_ra>
// kernel: tpu_custom_call.1
= control target key start
LH: loop header
LB: loop body
LE: loop exit
PB: predicated region body
PF: predicated region fallthrough
CT: control target
= control target key end

     0   :  { %14 = vsyncpa [#allocation3], 0  ;;  %s2838_s0 = inlined_call_operand.vmem [shape: f32[2,64,128], index: 0, kind: input, shape index: {}]   ;;  %s2839_s1 = inlined_call_operand.hbm [shape: f32[1,128], index: 1, kind: input, shape index: {}]   ;;  %s2840_s2 = inlined_call_operand.hbm [shape: f32[64,128], index: 2, kind: input, shape index: {}]   ;;  %s2841_s3 = inlined_call_operand.hbm [shape: f32[128,384], index: 3, kind: input, shape index: {}]   ;;  %s2842_s4 = inlined_call_operand.vmem [shape: f32[1,384], index: 4, kind: input, shape index: {}]   ;;  %s2843_s5 = inlined_call_operand.hbm [shape: f32[128,128], index: 5, kind: input, shape index: {}]   ;;  %s2844_s6 = inlined_call_operand.vmem [shape: f32[1,128], index: 6, kind: input, shape index: {}]   ;;  %s2845_s7 = inlined_call_operand.vmem [shape: f32[128,4], index: 7, kind: input, shape index: {}]   ;;  %s2846_s8 = inlined_call_operand.vmem [shape: f32[4,128], index: 8, kind: input, shape index: {}]   ;;  %s2847_s9 = inlined_call_operand.hbm [shape: f32[2,1,128], index: 9, kind: output, shape index: {}]  }
   0x1   :  { %15 = vsyncpa [#allocation6], 0 }
   0x2   :  { %16 = vsyncpa [#allocation9], 0 }
   0x3   :  { %17 = vsyncpa [#allocation4], 0 }
   0x4   :  { %19 = vsyncpa [#allocation4 + $0x1], 0  ;;  %s2299_s30 = smov 0   ;;  %s2301_s10 = smov 0  }
   0x5   :  { %s2303_s11 = smov 0   ;;  %s2305_s12 = smov 0  }
   0x6 LB: > { %2858 = sst [smem:[#allocation15_spill]] %s2223_s30  ;;  %s2320_s13 = sadd.s32 4294967295, %s2235_s12   ;;  %s2235_s12 = sphi %s2305_s12, %s2881_s12   ;;  %s2231_s11 = sphi %s2303_s11, %s2883_s11   ;;  %s2227_s10 = sphi %s2301_s10, %s2885_s10   ;;  %s2223_s30 = sphi %s2299_s30, %s2884_s30  }
   0x7   : > { %2859 = sst [smem:[#allocation16_spill]] %s2231_s11  ;;  %s1491_s14 = sadd.s32 4294967294, %s2235_s12  }
   0x8   : > { %s2324_s15 = sadd.s32 1, %s2235_s12   ;;  %s226_s16 = sadd.s32 1, %s2231_s11 }
   0x9   : > { %2860 = sst [smem:[#allocation17_spill]] %s2324_s15  ;;  %s223_s17 = ssub.s32 %s2235_s12, %s2324_s15 }
   0xa   : > { %p236_p0 = scmp.ne.s32.totalorder %s2231_s11, %s2227_s10  ;;  %p224_p1 = scmp.eq.s32.totalorder %s223_s17, 0 }
   0xb   : > { %p237_p2 = scmp.eq.s32.totalorder %s2320_s13, 1  ;;  %p242_p3 = scmp.ne.s32.totalorder %s2227_s10, %s2223_s30 }
   0xc   : > { %p243_p4 = scmp.eq.s32.totalorder %s1491_s14, 1  ;;  %p1492_p7 = scmp.ge.s32.totalorder %s2235_s12, 1 }
   0xd   : > { %s2335_s18 = scalar_select %p224_p1, %s2231_s11, %s226_s16  }
   0xe   : > { %p2337_p5 = por %p237_p2, %p236_p0  ;;  %p2341_p6 = por %p243_p4, %p242_p3 }
   0xf   : > { %2861 = sst [smem:[#allocation18_spill]] %s2335_s18  ;;  %p250_p8 = scmp.lt.s32.totalorder %s2235_s12, 3 }
  0x10   : > { %s2862_s19 = scalar_select %p2337_p5, 1, 0 }
  0x11   : > { %s2863_s20 = scalar_select %p2341_p6, 1, 0 }
  0x12   : > { %p2848_p9 = scmp.eq.s32.totalorder %s2320_s13, 0  ;;  %p2348_p10 = pnand %p1492_p7, %p250_p8 }
  0x13   : > { %2864 = sst [smem:[#allocation19_spill]] %s2863_s20  ;;  %s2237_s22 = smov [#allocation5]  }
  0x14   : > { %s2865_s21 = scalar_select %p2348_p10, 1, 0 }
  0x15   : > { %s273_s23 = sshll.u32 %s2237_s22, 4  ;;  %p1960_p11 = pneg %p2348_p10  ;;  %s2354_s23 = int_to_ptr.vmem [resolvable:$true] %s273_s23 }
  0x16   : > { %s2238_s25 = smov [#allocation2]   ;;  %s2239_s27 = smov [#allocation7]  }
  0x17   : > { %p2358_p12 = pnand %p2848_p9, %p1960_p11  ;;  %s263_s26 = sshll.u32 %s2238_s25, 4  ;;  %s2362_s26 = int_to_ptr.vmem [resolvable:$true] %s263_s26 }
  0x18   : > { %s2364_s28 = sshll.u32 %s2239_s27, 4  ;;  %s2049_s16 = scalar_lea.hbm %s2840_s2, 1024  ;;  %s287_s28 = int_to_ptr.vmem [resolvable:$true] %s2364_s28 }
  0x19   : > { %p2050_p13 = scmp.ne.s32.totalorder %s2840_s2, %s2049_s16  ;;  %p2374_p0 = pneg %p2358_p12 }
  0x1a   : > { %p2056_p3 = scmp.lt.u32.totalorder %s2049_s16, %s2840_s2 }
  0x1b   : > { %p2052_p1 = pnand %p2374_p0, %p2050_p13 }
  0x1d   : > { %p2053_p2 = pneg %p2052_p1 }
  0x1f   : > { %p2058_p4 = pnand %p2056_p3, %p2053_p2 }
  0x21   : > { %2061 = shalt.err (!%p2058_p4)
}
  0x22   : > { %s2062_s29 = scalar_lea.vmem %s2354_s23, 1024  ;;  %p2070_p9 = scmp.lt.s32.totalorder %s2354_s23, %s2354_s23 }
  0x23   : > { %p2063_p7 = scmp.ne.s32.totalorder %s2354_s23, %s2062_s29  ;;  %p2071_p6 = scmp.lt.s32.totalorder %s2062_s29, %s2062_s29 }
  0x25   : > { %p2065_p8 = pnand %p2063_p7, %p2374_p0  ;;  %p2072_p13 = por %p2071_p6, %p2070_p9 }
  0x27   : > { %p2066_p11 = pneg %p2065_p8 }
  0x29   : > { %p2073_p1 = pnand %p2072_p13, %p2066_p11 }
  0x2b   : > { %2076 = shalt.err (!%p2073_p1)
}
  0x2c   : > { %s2856_s14 = smov 128   ;;  %s2857_s16 = smov 8  }
  0x2d   : > { %1966 = dma.hbm_to_vmem [thread:$0]  (!%p2358_p12), %s2840_s2, 1024, %s2354_s23, [#allocation6], %s2856_s14, %s2856_s14, %s2857_s16  }
  0x2e   : > { %s2077_s29 = scalar_lea.hbm %s2839_s1, 16 }
  0x2f   : > { %p2078_p6 = scmp.ne.s32.totalorder %s2839_s1, %s2077_s29  ;;  %p2084_p3 = scmp.lt.u32.totalorder %s2077_s29, %s2839_s1 }
  0x31   : > { %p2080_p9 = pnand %p2078_p6, %p2374_p0 }
  0x33   : > { %p2081_p2 = pneg %p2080_p9 }
  0x35   : > { %p2086_p4 = pnand %p2084_p3, %p2081_p2 }
  0x37   : > { %2089 = shalt.err (!%p2086_p4)
}
  0x38   : > { %s2090_s23 = scalar_lea.vmem %s2362_s26, 16  ;;  %s2097_s11 = scalar_lea.vmem %s2362_s26, 32 }
  0x39   : > { %p2091_p7 = scmp.ne.s32.totalorder %s2362_s26, %s2090_s23  ;;  %p2098_p13 = scmp.lt.s32.totalorder %s2362_s26, %s2362_s26 }
  0x3a   : > { %p2099_p1 = scmp.lt.s32.totalorder %s2097_s11, %s2090_s23 }
  0x3b   : > { %p2093_p8 = pnand %p2091_p7, %p2374_p0 }
  0x3c   : > { %p2100_p6 = por %p2099_p1, %p2098_p13 }
  0x3d   : > { %p2094_p11 = pneg %p2093_p8 }
  0x3f   : > { %p2101_p9 = pnand %p2100_p6, %p2094_p11 }
  0x41   : > { %2104 = shalt.err (!%p2101_p9)
}
  0x42   : > { %1963 = dma.hbm_to_vmem [thread:$0]  (!%p2358_p12), %s2839_s1, 16, %s2362_s26, [#allocation3]  }
  0x43   : > { %s2105_s22 = scalar_lea.hbm %s2841_s3, 6144 }
  0x44   : > { %p2106_p2 = scmp.ne.s32.totalorder %s2841_s3, %s2105_s22  ;;  %p2112_p7 = scmp.lt.u32.totalorder %s2105_s22, %s2841_s3 }
  0x46   : > { %p2108_p3 = pnand %p2106_p2, %p2374_p0 }
  0x48   : > { %p2109_p4 = pneg %p2108_p3 }
  0x4a   : > { %p2114_p8 = pnand %p2112_p7, %p2109_p4 }
  0x4c   : > { %2117 = shalt.err (!%p2114_p8)
}
  0x4d   : > { %s2118_s11 = scalar_lea.vmem %s287_s28, 6144  ;;  %p2126_p6 = scmp.lt.s32.totalorder %s287_s28, %s287_s28 }
  0x4e   : > { %p2119_p11 = scmp.ne.s32.totalorder %s287_s28, %s2118_s11  ;;  %p2127_p9 = scmp.lt.s32.totalorder %s2118_s11, %s2118_s11 }
  0x50   : > { %p2121_p13 = pnand %p2119_p11, %p2374_p0  ;;  %p2128_p5 = por %p2127_p9, %p2126_p6 }
  0x52   : > { %p2122_p1 = pneg %p2121_p13 }
  0x54   : > { %p2129_p10 = pnand %p2128_p5, %p2122_p1 }
  0x56   : > { %2132 = shalt.err (!%p2129_p10)
}
  0x57   : > { %s2242_s26 = smov 384   ;;  %s2243_s30 = smov 24  }
  0x58   : > { %1969 = dma.hbm_to_vmem [thread:$0]  (!%p2358_p12), %s2841_s3, 6144, %s287_s28, [#allocation6], %s2242_s26, %s2242_s26, %s2243_s30  }
  0x59   : > { %s2244_s17 = smov [#allocation8]   ;;  %s2133_s29 = scalar_lea.hbm %s2843_s5, 2048 }
  0x5a   : > { %s302_s22 = sshll.u32 %s2244_s17, 4  ;;  %p2134_p5 = scmp.ne.s32.totalorder %s2843_s5, %s2133_s29  ;;  %s303_s22 = int_to_ptr.vmem [resolvable:$true] %s302_s22 }
  0x5b   : > { %p2140_p3 = scmp.lt.u32.totalorder %s2133_s29, %s2843_s5 }
  0x5c   : > { %p2136_p10 = pnand %p2134_p5, %p2374_p0 }
  0x5e   : > { %p2137_p2 = pneg %p2136_p10 }
  0x60   : > { %p2142_p4 = pnand %p2140_p3, %p2137_p2 }
  0x62   : > { %2145 = shalt.err (!%p2142_p4)
}
  0x63   : > { %s2146_s28 = scalar_lea.vmem %s303_s22, 2048  ;;  %p2154_p13 = scmp.lt.s32.totalorder %s303_s22, %s303_s22 }
  0x64   : > { %p2147_p7 = scmp.ne.s32.totalorder %s303_s22, %s2146_s28  ;;  %p2155_p1 = scmp.lt.s32.totalorder %s2146_s28, %s2146_s28 }
  0x66   : > { %p2149_p8 = pnand %p2147_p7, %p2374_p0  ;;  %p2156_p6 = por %p2155_p1, %p2154_p13 }
  0x68   : > { %p2150_p11 = pneg %p2149_p8 }
  0x6a   : > { %p2157_p9 = pnand %p2156_p6, %p2150_p11 }
  0x6c   : > { %2160 = shalt.err (!%p2157_p9)
}
  0x6d   : > { %s2868_s26 = smov 8   ;;  %s2869_s30 = smov 128  }
  0x6e   : > { %1972 = dma.hbm_to_vmem [thread:$0]  (!%p2358_p12), %s2843_s5, 2048, %s303_s22, [#allocation9], %s2869_s30, %s2869_s30, %s2868_s26  }
  0x6f   : > { %p2870_p5 = scmp.ne.s32.totalorder %s2865_s21, 0 }
  0x70   : > { %p2871_p0 = scmp.eq.s32.totalorder (!%p2870_p5), %s2320_s13, 0 }
  0x71   : > { %335 = sbr.rel (%p2870_p5) target bundleno = 1213 (0x4bd), region = 56 }
  0x78   : > { %2206 = dma.done.wait (%p2871_p0), [#allocation3], 16   ;;  %p2872_p10 = pmov %p2871_p0 }
  0x79   : > { %p2873_p2 = pmov %p2871_p0 }
  0x7a   : > { %2208 = vsyncadd (%p2872_p10), [#allocation3], 4294967280 }
  0x7b   : > { %2210 = dma.done.wait (%p2873_p2), [#allocation6], 7168   ;;  %p2874_p3 = pmov %p2871_p0 }
  0x7c   : > { %p2875_p4 = pmov %p2871_p0 }
  0x7d   : > { %2212 = vsyncadd (%p2874_p3), [#allocation6], 4294960128 }
  0x7e   : > { %2214 = dma.done.wait (%p2875_p4), [#allocation9], 2048   ;;  %p2876_p12 = pmov %p2871_p0 }
  0x7f   : > { %v2245_v0 = vmov 0.0   ;;  %v2246_v1 = vmov 0.0|0.0   ;;  %p382_p7 = scmp.lt.s32.totalorder %s2320_s13, 1  ;;  %v429_v2 = vld [vmem:[#allocation7 + $0x8] sm:$0xff]  ;;  %v432_v3 = vld [vmem:[#allocation7 + $0x20] sm:$0xff]  ;;  %v431_v6 = vld [vmem:[#allocation7 + $0x18] sm:$0xff] }
  0x80   : > { %2216 = vsyncadd (%p2876_p12), [#allocation9], 4294965248  ;;  %557 = vmatprep.mubr.f32.mxu0 %v2245_v0  ;;  %1806 = vmatprep.subr.bf16.mxu1 %v2246_v1  ;;  %v428_v4 = vld [vmem:[#allocation7] sm:$0xff]  ;;  %v2480_v5 = vpack.c.bf16 %v432_v3, %v429_v2  ;;  %v435_v7 = vld [vmem:[#allocation7 + $0x38] sm:$0xff]  ;;  %vm2247_vm0 = vmmov 0   ;;  %vm1089_vm1 = vcmask 1043456  }
  0x81   : > { %s383_s18 = scalar_select %p382_p7, %s2320_s13, 1  ;;  %v438_v8 = vld [vmem:[#allocation7 + $0x50] sm:$0xff]  ;;  %v1776_v9 = vpack.c.bf16 %v431_v6, %v428_v4  ;;  %v437_v12 = vld [vmem:[#allocation7 + $0x48] sm:$0xff]  ;;  %v444_v14 = vld [vmem:[#allocation7 + $0x80] sm:$0xff]  ;;  %1638 = vmatprep.mubr.msk.f32.mxu1 %vm2247_vm0, %v2245_v0  ;;  %vm973_vm2 = vcmask 31744  }
  0x82   : > { %v2482_v10 = vpack.c.bf16 %v438_v8, %v435_v7  ;;  %v434_v11 = vld [vmem:[#allocation7 + $0x30] sm:$0xff]  ;;  %v441_v13 = vld [vmem:[#allocation7 + $0x68] sm:$0xff]  ;;  %1775 = vmatprep.subr.bf16.mxu0 %v2480_v5  ;;  %v440_v17 = vld [vmem:[#allocation7 + $0x60] sm:$0xff]  ;;  %s380_s29 = sand.u32 1, %s2227_s10   ;;  %s1516_s28 = sshll.u32 %s2320_s13, 4 }
  0x83   : > { %1777 = vmatpush1.bf16.msra.mxu0 %v1776_v9  ;;  %v1780_v15 = vpack.c.bf16 %v437_v12, %v434_v11  ;;  %s1519_s21 = sshll.u32 %s383_s18, 6  ;;  %v2486_v16 = vpack.c.bf16 %v444_v14, %v441_v13  ;;  %v443_v18 = vld [vmem:[#allocation7 + $0x78] sm:$0xff]  ;;  %v450_v20 = vld [vmem:[#allocation7 + $0xb0] sm:$0xff]  ;;  %v449_v24 = vld [vmem:[#allocation7 + $0xa8] sm:$0xff]  ;;  %s381_s26 = scalar_lea.vmem [#allocation10], %s380_s29 }
  0x84   : > { %1779 = vmatprep.subr.bf16.mxu0 %v2482_v10  ;;  %v447_v19 = vld [vmem:[#allocation7 + $0x98] sm:$0xff]  ;;  %s2491_s20 = scalar_lea.vmem %s2838_s0, %s1519_s21  ;;  %v1784_v21 = vpack.c.bf16 %v443_v18, %v440_v17  ;;  %v446_v23 = vld [vmem:[#allocation7 + $0x90] sm:$0xff]  ;;  %v453_v25 = vld [vmem:[#allocation7 + $0xc8] sm:$0xff]  ;;  %s1395_s30 = sshll.u32 %s381_s26, 4  ;;  %s2798_s30 = int_to_ptr.vmem [resolvable:$true] %s1395_s30 }
  0x85   : > { %v2494_v22 = vpack.c.bf16 %v450_v20, %v447_v19  ;;  %v456_v26 = vld [vmem:[#allocation7 + $0xe0] sm:$0xff]  ;;  %v2503_v29 = vld [vmem:[%s2491_s20 + $0x10] sm:$0xff]  ;;  %v1788_v30 = vpack.c.bf16 %v449_v24, %v446_v23  ;;  %v455_v34 = vld [vmem:[#allocation7 + $0xd8] sm:$0xff]  ;;  %s2796_s18 = scalar_lea.hbm %s2847_s9, %s1516_s28  ;;  %s1383_s21 = scalar_lea.sflag [#allocation4], %s380_s29 }
  0x86   : > { %v2497_v27 = vld [vmem:[%s2491_s20] sm:$0xff]  ;;  %v2500_v28 = vld [vmem:[%s2491_s20 + $0x8] sm:$0xff]  ;;  %v2508_v33 = vpack.c.bf16 %v456_v26, %v453_v25  ;;  %v2511_v35 = vld [vmem:[%s2491_s20 + $0x18] sm:$0xff]  ;;  %s2161_s24 = scalar_lea.vmem %s2798_s30, 16  ;;  %p2877_p11 = scmp.ne.s32.totalorder %s2862_s19, 0 }
  0x87   : > { %1781 = vmatpush1.bf16.msra.mxu0 %v1780_v15  ;;  %v452_v31 = vld [vmem:[#allocation7 + $0xc0] sm:$0xff]  ;;  %v395_v32 = vadd.f32 %v2500_v28, %v2497_v27  ;;  %v430_v36 = vld [vmem:[#allocation7 + $0x10] sm:$0xff]  ;;  %v459_v37 = vld [vmem:[#allocation7 + $0xf8] sm:$0xff]  ;;  %p2162_p8 = scmp.ne.s32.totalorder %s2798_s30, %s2161_s24  ;;  %s2248_s13 = smov [#allocation10]  }
  0x88   : > { %1783 = vmatprep.subr.bf16.mxu0 %v2486_v16  ;;  %v462_v38 = vld [vmem:[#allocation7 + $0x110] sm:$0xff]  ;;  %v433_v40 = vld [vmem:[#allocation7 + $0x28] sm:$0xff]  ;;  %v2515_v41 = vld [vmem:[%s2491_s20 + $0x20] sm:$0xff]  ;;  %v1792_v43 = vpack.c.bf16 %v455_v34, %v452_v31  ;;  %s2165_s15 = sshll.u32 %s2248_s13, 4  ;;  %s2166_s15 = int_to_ptr.vmem [resolvable:$false] %s2165_s15 }
  0x89   : > { %v396_v39 = vadd.f32 %v395_v32, %v2503_v29  ;;  %v1807_v42 = vpack.c.bf16 %v433_v40, %v430_v36  ;;  %v436_v45 = vld [vmem:[#allocation7 + $0x40] sm:$0xff]  ;;  %v439_v46 = vld [vmem:[#allocation7 + $0x58] sm:$0xff]  ;;  %v2519_v47 = vpack.c.bf16 %v462_v38, %v459_v37  ;;  %v458_v48 = vld [vmem:[#allocation7 + $0xf0] sm:$0xff]  ;;  %p2163_p13 = pnand %p2162_p8, %p2877_p11  ;;  %p2168_p6 = scmp.lt.s32.totalorder %s2798_s30, %s2166_s15 }
  0x8a   : > { %v461_v49 = vld [vmem:[#allocation7 + $0x108] sm:$0xff]  ;;  %v468_v52 = vld [vmem:[#allocation7 + $0x140] sm:$0xff]  ;;  %v2529_v55 = vpack.c.bf16 %v439_v46, %v436_v45  ;;  %v442_v58 = vld [vmem:[#allocation7 + $0x70] sm:$0xff] }
  0x8b   : > { %1785 = vmatpush1.bf16.msra.mxu0 %v1784_v21  ;;  %v397_v44 = vadd.f32 %v396_v39, %v2511_v35  ;;  %v2522_v50 = vld [vmem:[%s2491_s20 + $0x28] sm:$0xff]  ;;  %1808 = vmatpush3.bf16.msra.mxu1 %v1807_v42  ;;  %v2527_v54 = vld [vmem:[%s2491_s20 + $0x30] sm:$0xff]  ;;  %v1796_v56 = vpack.c.bf16 %v461_v49, %v458_v48  ;;  %v467_v62 = vld [vmem:[#allocation7 + $0x138] sm:$0xff]  ;;  %p2164_p1 = pneg %p2163_p13 }
  0x8c   : > { %1787 = vmatprep.subr.bf16.mxu0 %v2494_v22  ;;  %v465_v51 = vld [vmem:[#allocation7 + $0x128] sm:$0xff]  ;;  %1809 = vmatprep.subr.bf16.mxu1 %v2246_v1  ;;  %v464_v61 = vld [vmem:[#allocation7 + $0x120] sm:$0xff]  ;;  %v2536_v63 = vld [vmem:[%s2491_s20 + $0x38] sm:$0xff]  ;;  %s2167_s20 = scalar_lea.vmem %s2166_s15, 32 }
  0x8d   : > { %v398_v53 = vadd.f32 %v397_v44, %v2515_v41  ;;  %v445_v59 = vld [vmem:[#allocation7 + $0x88] sm:$0xff]  ;;  %v2533_v60 = vpack.c.bf16 %v468_v52, %v465_v51  ;;  %v471_v2 = vld [vmem:[#allocation7 + $0x158] sm:$0xff]  ;;  %v474_v3 = vld [vmem:[#allocation7 + $0x170] sm:$0xff]  ;;  %v1800_v7 = vpack.c.bf16 %v467_v62, %v464_v61  ;;  %p2169_p9 = scmp.lt.s32.totalorder %s2167_s20, %s2161_s24 }
  0x8e   : > { %v1813_v6 = vpack.c.bf16 %v445_v59, %v442_v58  ;;  %v448_v9 = vld [vmem:[#allocation7 + $0xa0] sm:$0xff]  ;;  %v451_v11 = vld [vmem:[#allocation7 + $0xb8] sm:$0xff]  ;;  %v1802_v12 = vpack.c.bf16 %v474_v3, %v471_v2  ;;  %v470_v13 = vld [vmem:[#allocation7 + $0x150] sm:$0xff] }
  0x8f   : > { %1789 = vmatpush1.bf16.msra.mxu0 %v1788_v30  ;;  %v399_v57 = vadd.f32 %v398_v53, %v2522_v50  ;;  %1811 = vmatpush3.bf16.msra.mxu1 %v2529_v55  ;;  %v473_v14 = vld [vmem:[#allocation7 + $0x168] sm:$0xff]  ;;  %v1816_v17 = vpack.c.bf16 %v451_v11, %v448_v9  ;;  %v454_v20 = vld [vmem:[#allocation7 + $0xd0] sm:$0xff]  ;;  %v460_v26 = vld [vmem:[#allocation7 + $0x100] sm:$0xff]  ;;  %p2170_p5 = por %p2169_p9, %p2168_p6 }
  0x90   : > { %1791 = vmatprep.subr.bf16.mxu0 %v2508_v33  ;;  %1812 = vmatprep.subr.bf16.mxu1 %v2246_v1  ;;  %v1804_v18 = vpack.c.bf16 %v473_v14, %v470_v13  ;;  %v457_v21 = vld [vmem:[#allocation7 + $0xe8] sm:$0xff]  ;;  %v463_v30 = vld [vmem:[#allocation7 + $0x118] sm:$0xff]  ;;  %v466_v36 = vld [vmem:[#allocation7 + $0x130] sm:$0xff] }
  0x91   : > { %v400_v4 = vadd.f32 %v399_v57, %v2527_v54  ;;  %v1819_v24 = vpack.c.bf16 %v457_v21, %v454_v20  ;;  %v1822_v32 = vpack.c.bf16 %v463_v30, %v460_v26  ;;  %v469_v37 = vld [vmem:[#allocation7 + $0x148] sm:$0xff]  ;;  %v410_v38 = vld [vmem:[#allocation2] sm:$0x1]  ;;  %v472_v44 = vld [vmem:[#allocation7 + $0x160] sm:$0xff]  ;;  %p2171_p0 = pnand %p2170_p5, %p2164_p1 }
  0x92   : > { %v1825_v40 = vpack.c.bf16 %v469_v37, %v466_v36  ;;  %v475_v45 = vld [vmem:[#allocation7 + $0x178] sm:$0xff]  ;;  %v782_v58 = vld [vmem:[%s2845_s7 + $0x8] sm:$0xff]  ;;  %v783_v59 = vld [vmem:[%s2845_s7 + $0x10] sm:$0xff] }
  0x93   : > { %1793 = vmatpush1.bf16.msra.mxu0 %v1792_v43  ;;  %v401_v8 = vadd.f32 %v400_v4, %v2536_v63  ;;  %1814 = vmatpush3.bf16.msra.mxu1 %v1813_v6  ;;  %v784_v61 = vld [vmem:[%s2845_s7 + $0x18] sm:$0xff]  ;;  %v786_v2 = vld [vmem:[%s2845_s7 + $0x28] sm:$0xff]  ;;  %v787_v4 = vld [vmem:[%s2845_s7 + $0x30] sm:$0xff] }
  0x94   : > { %1795 = vmatprep.subr.bf16.mxu0 %v2519_v47  ;;  %1815 = vmatprep.subr.bf16.mxu1 %v2246_v1  ;;  %v2603_v62 = vpack.c.bf16 %v784_v61, %v783_v59  ;;  %v790_v9 = vld [vmem:[%s2845_s7 + $0x48] sm:$0xff]  ;;  %v792_v13 = vld [vmem:[%s2845_s7 + $0x58] sm:$0xff] }
  0x95   : > { %v402_v15 = vrot.slane %v401_v8, 4  ;;  %v796_v20 = vld [vmem:[%s2845_s7 + $0x78] sm:$0xff] }
  0x97   : > { %1797 = vmatpush1.bf16.msra.mxu0 %v1796_v56  ;;  %v403_v19 = vadd.f32 %v402_v15, %v401_v8  ;;  %1817 = vmatpush3.bf16.msra.mxu1 %v1816_v17  ;;  %v634_v56 = vld [vmem:[%s2842_s4 + $0x1] sm:$0x3] }
  0x98   : > { %1799 = vmatprep.subr.bf16.mxu0 %v2533_v60  ;;  %1818 = vmatprep.subr.bf16.mxu1 %v2246_v1  ;;  %v789_v8 = vld [vmem:[%s2845_s7 + $0x40] sm:$0xff] }
  0x99   : > { %v404_v23 = vrot.slane %v403_v19, 2  ;;  %v2634_v11 = vpack.c.bf16 %v790_v9, %v789_v8  ;;  %v793_v15 = vld [vmem:[%s2845_s7 + $0x60] sm:$0xff] }
  0x9b   : > { %1801 = vmatpush1.bf16.msra.mxu0 %v1800_v7  ;;  %v405_v25 = vadd.f32 %v404_v23, %v403_v19  ;;  %1820 = vmatpush3.bf16.msra.mxu1 %v1819_v24  ;;  %v795_v19 = vld [vmem:[%s2845_s7 + $0x70] sm:$0xff] }
  0x9c   : > { %1803 = vmatprep.subr.bf16.mxu0 %v1802_v12  ;;  %1821 = vmatprep.subr.bf16.mxu1 %v2246_v1  ;;  %v2665_v21 = vpack.c.bf16 %v796_v20, %v795_v19 }
  0x9d   : > { %v406_v31 = vrot.slane %v405_v25, 1 }
  0x9f   : > { %1805 = vmatpush1.bf16.msra.mxu0 %v1804_v18  ;;  %v407_v34 = vadd.f32 %v406_v31, %v405_v25  ;;  %1823 = vmatpush3.bf16.msra.mxu1 %v1822_v32 }
  0xa0   : > { %1831 = vmatprep.subr.bf16.mxu0 %v1807_v42  ;;  %1824 = vmatprep.subr.bf16.mxu1 %v2246_v1  ;;  %v1828_v42 = vpack.c.bf16 %v475_v45, %v472_v44 }
  0xa1   : > { %v409_v39 = vmul.f32 0.015625, %v407_v34 }
  0xa3   : > { %v2547_v43 = vadd.f32 %v410_v38, %v409_v39  ;;  %1826 = vmatpush3.bf16.msra.mxu1 %v1825_v40 }
  0xa4   : > { %1827 = vmatprep.subr.bf16.mxu1 %v2246_v1 }
  0xa5   : > { %558 = vmatmul.mubr.f32.vlgmr.msra.gmra.mrb[0].mxu0 %v2547_v43 }
  0xa6   : > { %1833 = vmatpush1.bf16.msra.mxu0 %v2480_v5  ;;  %710 = vmatprep.mubr.f32.mxu0 %v2245_v0  ;;  %v412_v5 = vld [vmem:[#allocation5] sm:$0xff] }
  0xa7   : > { %1835 = vmatprep.subr.bf16.mxu0 %v2529_v55  ;;  %1829 = vmatpush3.bf16.msra.mxu1 %v1828_v42  ;;  %v420_v46 = vadd.f32 %v412_v5, %v2497_v27  ;;  %v416_v27 = vld [vmem:[#allocation5 + $0x20] sm:$0xff] }
  0xa8   : > { %v424_v49 = vadd.f32 %v416_v27, %v2515_v41  ;;  %v478_v41 = vlaneseq }
  0xaa   : > { %1837 = vmatpush1.bf16.msra.mxu0 %v2482_v10  ;;  %v413_v10 = vld [vmem:[#allocation5 + $0x8] sm:$0xff]  ;;  %v2576_v55 = vshrl.u32 %v478_v41, 7  ;;  %1639 = vmatmul.mubr.f32.vlgmr.msra.gmra.mrb[0].mxu1 %v2547_v43 }
  0xab   : > { %1839 = vmatprep.subr.bf16.mxu0 %v1813_v6  ;;  %v788_v6 = vld [vmem:[%s2845_s7 + $0x38] sm:$0xff] }
  0xac   : > { %v2624_v7 = vpack.c.bf16 %v788_v6, %v787_v4  ;;  %v2671_v23 = vsub.s32 0, %v2576_v55 }
  0xae   : > { %1841 = vmatpush1.bf16.msra.mxu0 %v2486_v16  ;;  %v421_v16 = vadd.f32 %v413_v10, %v2500_v28  ;;  %v417_v28 = vld [vmem:[#allocation5 + $0x28] sm:$0xff]  ;;  %v639_v39 = vrot.slane %v634_v56, %v2671_v23 }
  0xaf   : > { %1843 = vmatprep.subr.bf16.mxu0 %v1816_v17  ;;  %v425_v51 = vadd.f32 %v417_v28, %v2522_v50  ;;  %v484_v50 = vsub.s32 1, %v2576_v55  ;;  %v794_v17 = vld [vmem:[%s2845_s7 + $0x68] sm:$0xff] }
  0xb0   : > { %v2655_v18 = vpack.c.bf16 %v794_v17, %v793_v15 }
  0xb1   : > { %v2582_v57 = vrot.slane %v634_v56, %v484_v50 }
  0xb2   : > { %1845 = vmatpush1.bf16.msra.mxu0 %v2494_v22  ;;  %v414_v22 = vld [vmem:[#allocation5 + $0x10] sm:$0xff] }
  0xb3   : > { %1847 = vmatprep.subr.bf16.mxu0 %v1819_v24  ;;  %v2676_v24 = vld [vmem:[%s2842_s4] sm:$0x7] }
  0xb4   : > { %v481_v25 = vrot.slane %v2676_v24, %v2671_v23  ;;  %v485_v26 = vrot.slane %v2676_v24, %v484_v50 }
  0xb6   : > { %1849 = vmatpush1.bf16.msra.mxu0 %v2508_v33  ;;  %v422_v33 = vadd.f32 %v414_v22, %v2503_v29  ;;  %v418_v29 = vld [vmem:[#allocation5 + $0x30] sm:$0xff] }
  0xb7   : > { %1851 = vmatprep.subr.bf16.mxu0 %v1822_v32  ;;  %v426_v52 = vadd.f32 %v418_v29, %v2527_v54  ;;  %v781_v54 = vld [vmem:[%s2845_s7] sm:$0xff] }
  0xba   : > { %1853 = vmatpush1.bf16.msra.mxu0 %v2519_v47  ;;  %v415_v47 = vld [vmem:[#allocation5 + $0x18] sm:$0xff] }
  0xbb   : > { %1855 = vmatprep.subr.bf16.mxu0 %v1825_v40  ;;  %v423_v48 = vadd.f32 %v415_v47, %v2511_v35  ;;  %v419_v35 = vld [vmem:[#allocation5 + $0x38] sm:$0xff] }
  0xbc   : > { %v427_v53 = vadd.f32 %v419_v35, %v2536_v63  ;;  %v785_v63 = vld [vmem:[%s2845_s7 + $0x20] sm:$0xff] }
  0xbd   : > { %v2614_v3 = vpack.c.bf16 %v786_v2, %v785_v63 }
  0xbe   : > { %1857 = vmatpush1.bf16.msra.mxu0 %v2533_v60  ;;  %v2595_v60 = vpack.c.bf16 %v782_v58, %v781_v54 }
  0xbf   : > { %1859 = vmatprep.subr.bf16.mxu0 %v1828_v42 }
  0xc0   : > { %1863 = vmatprep.subr.bf16.mxu1 %v2595_v60 }
  0xc1   : > { %1865 = vmatpush3.bf16.msra.mxu1 %v2595_v60 }
  0xc2   : > { %1861 = vmatpush1.bf16.msra.mxu0 %v1802_v12  ;;  %1867 = vmatprep.subr.bf16.mxu1 %v2603_v62  ;;  %v791_v12 = vld [vmem:[%s2845_s7 + $0x50] sm:$0xff] }
  0xc3   : > { %1918 = vmatprep.subr.bf16.mxu0 %v2246_v1  ;;  %v2644_v14 = vpack.c.bf16 %v792_v13, %v791_v12 }
  0xc5   : > { %711 = vmatmul.mubr.f32.vlgmr.msra.gmra.mrb[2].mxu0 %v420_v46  ;;  %1869 = vmatpush3.bf16.msra.mxu1 %v2603_v62 }
  0xc6   : > { %716 = vmatprep.mubr.f32.mxu0 %v2245_v0  ;;  %1871 = vmatprep.subr.bf16.mxu1 %v2614_v3 }
  0xc9   : > { %717 = vmatmul.mubr.f32.gmra.mrb[4].mxu0 %v421_v16  ;;  %1873 = vmatpush3.bf16.msra.mxu1 %v2614_v3 }
  0xca   : > { %722 = vmatprep.mubr.f32.mxu0 %v2245_v0  ;;  %1875 = vmatprep.subr.bf16.mxu1 %v2624_v7 }
  0xcd   : > { %723 = vmatmul.mubr.f32.gmra.mrb[6].mxu0 %v422_v33  ;;  %1877 = vmatpush3.bf16.msra.mxu1 %v2624_v7 }
  0xce   : > { %728 = vmatprep.mubr.f32.mxu0 %v2245_v0  ;;  %1879 = vmatprep.subr.bf16.mxu1 %v2634_v11 }
  0xd1   : > { %729 = vmatmul.mubr.f32.gmra.mrb[8].mxu0 %v423_v48  ;;  %1881 = vmatpush3.bf16.msra.mxu1 %v2634_v11 }
  0xd2   : > { %734 = vmatprep.mubr.f32.mxu0 %v2245_v0  ;;  %1883 = vmatprep.subr.bf16.mxu1 %v2644_v14 }
  0xd5   : > { %735 = vmatmul.mubr.f32.gmra.mrb[10].mxu0 %v424_v49  ;;  %1885 = vmatpush3.bf16.msra.mxu1 %v2644_v14 }
  0xd6   : > { %740 = vmatprep.mubr.f32.mxu0 %v2245_v0  ;;  %1887 = vmatprep.subr.bf16.mxu1 %v2655_v18 }
  0xd9   : > { %741 = vmatmul.mubr.f32.gmra.mrb[12].mxu0 %v425_v51  ;;  %1889 = vmatpush3.bf16.msra.mxu1 %v2655_v18 }
  0xda   : > { %746 = vmatprep.mubr.f32.mxu0 %v2245_v0  ;;  %1891 = vmatprep.subr.bf16.mxu1 %v2665_v21 }
  0xdd   : > { %747 = vmatmul.mubr.f32.gmra.mrb[14].mxu0 %v426_v52  ;;  %1893 = vmatpush3.bf16.msra.mxu1 %v2665_v21 }
  0xde   : > { %752 = vmatprep.mubr.f32.mxu0 %v2245_v0  ;;  %1894 = vmatprep.subr.bf16.mxu1 %v2246_v1 }
  0xe1   : > { %753 = vmatmul.mubr.f32.gmra.mrb[16].mxu0 %v427_v53 }
  0xe2   : > { %1771 = vmatprep.mubr.msk.f32.mxu0 %vm2247_vm0, %v2245_v0 }
 0x178   : > { %v559_v30 = vpop.f32.mrb[0].mxu0 }
 0x179   : > { %v560_v31 = vadd.f32 %v559_v30, %v481_v25  ;;  %v561_v32 = vpop.f32.mrb[1].mxu0 }
 0x17a   : > { %v562_v34 = vadd.f32 %v561_v32, %v485_v26 }
 0x17b   : > { %v759_v36 = vmul.f32 0.4204482, %v560_v31 }
 0x17c   : > { %v760_v37 = vmul.f32 0.4204482, %v562_v34 }
 0x17d   : > { %v772_v42 = vrot.slane %v759_v36, %v2671_v23 }
 0x17e   : > { %v2681_v38 = vmul.f32 %v760_v37, %v759_v36 }
 0x198   : > { %v712_v40 = vpop.f32.mrb[2].mxu0 }
 0x199   : > { %v713_v43 = vadd.f32 %v712_v40, %v639_v39  ;;  %v714_v44 = vpop.f32.mrb[3].mxu0 }
 0x19a   : > { %v2685_v45 = vadd.f32 %v714_v44, %v2582_v57 }
 0x19b   : > { %v761_v5 = vmul.f32 0.4204482, %v713_v43 }
 0x19c   : > { %v718_v46 = vpop.f32.mrb[4].mxu0 }
 0x19d   : > { %v773_v10 = vmul.f32 %v772_v42, %v761_v5  ;;  %v719_v16 = vadd.f32 %v718_v46, %v639_v39  ;;  %v720_v22 = vpop.f32.mrb[5].mxu0 }
 0x19e   : > { %v2689_v33 = vadd.f32 %v720_v22, %v2582_v57 }
 0x19f   : > { %v762_v47 = vmul.f32 0.4204482, %v719_v16  ;;  %1673 = vmatprep.mubr.f32.mxu1 %v773_v10 }
 0x1a0   : > { %v724_v48 = vpop.f32.mrb[6].mxu0 }
 0x1a1   : > { %v774_v27 = vmul.f32 %v772_v42, %v762_v47  ;;  %v725_v49 = vadd.f32 %v724_v48, %v639_v39  ;;  %v726_v28 = vpop.f32.mrb[7].mxu0 }
 0x1a2   : > { %v2692_v51 = vadd.f32 %v726_v28, %v2582_v57 }
 0x1a3   : > { %v763_v29 = vmul.f32 0.4204482, %v725_v49  ;;  %1674 = vmatmul.mubr.f32.vlgmr.msra.gmra.mrb[2].mxu1 %v774_v27 }
 0x1a4   : > { %1896 = vmatpush3.bf16.msra.mxu1 %v2595_v60  ;;  %v730_v52 = vpop.f32.mrb[8].mxu0 }
 0x1a5   : > { %v775_v35 = vmul.f32 %v772_v42, %v763_v29  ;;  %v731_v53 = vadd.f32 %v730_v52, %v639_v39  ;;  %v732_v41 = vpop.f32.mrb[9].mxu0  ;;  %1897 = vmatprep.subr.bf16.mxu1 %v2246_v1 }
 0x1a6   : > { %v2697_v50 = vadd.f32 %v732_v41, %v2582_v57 }
 0x1a7   : > { %v764_v56 = vmul.f32 0.4204482, %v731_v53  ;;  %1676 = vmatprep.mubr.f32.mxu1 %v775_v35 }
 0x1a8   : > { %1899 = vmatpush3.bf16.msra.mxu1 %v2603_v62  ;;  %v736_v54 = vpop.f32.mrb[10].mxu0 }
 0x1a9   : > { %v776_v58 = vmul.f32 %v772_v42, %v764_v56  ;;  %v737_v59 = vadd.f32 %v736_v54, %v639_v39  ;;  %v738_v61 = vpop.f32.mrb[11].mxu0  ;;  %1900 = vmatprep.subr.bf16.mxu1 %v2246_v1 }
 0x1aa   : > { %v2702_v60 = vadd.f32 %v738_v61, %v2582_v57 }
 0x1ab   : > { %v765_v63 = vmul.f32 0.4204482, %v737_v59  ;;  %1677 = vmatmul.mubr.f32.gmra.mrb[4].mxu1 %v776_v58 }
 0x1ac   : > { %1902 = vmatpush3.bf16.msra.mxu1 %v2614_v3  ;;  %v742_v2 = vpop.f32.mrb[12].mxu0 }
 0x1ad   : > { %v777_v4 = vmul.f32 %v772_v42, %v765_v63  ;;  %v743_v6 = vadd.f32 %v742_v2, %v639_v39  ;;  %v744_v8 = vpop.f32.mrb[13].mxu0  ;;  %1903 = vmatprep.subr.bf16.mxu1 %v2246_v1 }
 0x1ae   : > { %v2707_v62 = vadd.f32 %v744_v8, %v2582_v57 }
 0x1af   : > { %v766_v9 = vmul.f32 0.4204482, %v743_v6  ;;  %1679 = vmatprep.mubr.f32.mxu1 %v777_v4 }
 0x1b0   : > { %1905 = vmatpush3.bf16.msra.mxu1 %v2624_v7  ;;  %v748_v12 = vpop.f32.mrb[14].mxu0 }
 0x1b1   : > { %v778_v13 = vmul.f32 %v772_v42, %v766_v9  ;;  %v749_v15 = vadd.f32 %v748_v12, %v639_v39  ;;  %v750_v17 = vpop.f32.mrb[15].mxu0  ;;  %1906 = vmatprep.subr.bf16.mxu1 %v2246_v1 }
 0x1b2   : > { %v2712_v3 = vadd.f32 %v750_v17, %v2582_v57 }
 0x1b3   : > { %v767_v19 = vmul.f32 0.4204482, %v749_v15  ;;  %1680 = vmatmul.mubr.f32.gmra.mrb[6].mxu1 %v778_v13 }
 0x1b4   : > { %1908 = vmatpush3.bf16.msra.mxu1 %v2634_v11  ;;  %v754_v20 = vpop.f32.mrb[16].mxu0 }
 0x1b5   : > { %v779_v25 = vmul.f32 %v772_v42, %v767_v19  ;;  %v755_v26 = vadd.f32 %v754_v20, %v639_v39  ;;  %v756_v30 = vpop.f32.mrb[17].mxu0  ;;  %1909 = vmatprep.subr.bf16.mxu1 %v2246_v1 }
 0x1b6   : > { %v2717_v7 = vadd.f32 %v756_v30, %v2582_v57  ;;  %v2727_v57 = vpop.f32.mrb[0].mxu1 }
 0x1b7   : > { %v768_v31 = vmul.f32 0.4204482, %v755_v26  ;;  %1682 = vmatprep.mubr.f32.mxu1 %v779_v25  ;;  %v1640_v11 = vpop.f32.mrb[1].mxu1 }
 0x1b8   : > { %1911 = vmatpush3.bf16.msra.mxu1 %v2644_v14  ;;  %v2732_v14 = vld [vmem:[%s2846_s8] sm:$0xf] }
 0x1b9   : > { %v780_v32 = vmul.f32 %v772_v42, %v768_v31  ;;  %1912 = vmatprep.subr.bf16.mxu1 %v2246_v1 }
 0x1bb   : > { %1683 = vmatmul.mubr.f32.gmra.mrb[8].mxu1 %v780_v32 }
 0x1bc   : > { %1914 = vmatpush3.bf16.msra.mxu1 %v2655_v18  ;;  %1717 = vmatprep.mubr.msk.f32.mxu1 %vm2247_vm0, %v2245_v0 }
 0x1bd   : > { %1915 = vmatprep.subr.bf16.mxu1 %v2246_v1 }
 0x1c0   : > { %1917 = vmatpush3.bf16.msra.mxu1 %v2665_v21 }
 0x1c1   : > { %1720 = vmatprep.subr.msk.mxu1 %vm1089_vm1, %v2732_v14 }
 0x1c3   : > { %1718 = vmatmul.mubr.f32.vlgmr.msra.gmra.mrb[10].mxu1 %v2681_v38 }
 0x1c4   : > { %1721 = vmatpush3.msk.msra.mxu1 %vm1089_vm1, %v2732_v14 }
 0x1c5   : > { %1734 = vmatprep.subr.mxu1 %v2245_v0 }
 0x276   : > { %v1675_v18 = vpop.f32.mrb[2].mxu1 }
 0x277   : > { %v863_v21 = vpop.f32.mrb[3].mxu1  ;;  %v975_v38 = vsel %vm973_vm2, %v1675_v18, -inf }
 0x278   : > { %v974_v43 = vsel %vm973_vm2, %v863_v21, -inf }
 0x27e   : > { %v1678_v34 = vpop.f32.mrb[4].mxu1 }
 0x27f   : > { %v873_v36 = vpop.f32.mrb[5].mxu1  ;;  %v977_v16 = vsel %vm973_vm2, %v1678_v34, -inf }
 0x280   : > { %v976_v48 = vsel %vm973_vm2, %v873_v36, -inf }
 0x286   : > { %v1681_v37 = vpop.f32.mrb[6].mxu1 }
 0x287   : > { %v980_v39 = vsel %vm973_vm2, %v1681_v37, -inf  ;;  %v883_v40 = vpop.f32.mrb[7].mxu1 }
 0x288   : > { %v981_v44 = vmax.f32 %v975_v38, %v980_v39  ;;  %v978_v42 = vsel %vm973_vm2, %v883_v40, -inf }
 0x289   : > { %v979_v5 = vmax.f32 %v974_v43, %v978_v42 }
 0x28b   : > { %v986_v46 = vmax.f32 %v979_v5, %v981_v44 }
 0x28e   : > { %v1684_v10 = vpop.f32.mrb[8].mxu1 }
 0x28f   : > { %v984_v22 = vsel %vm973_vm2, %v1684_v10, -inf  ;;  %v893_v47 = vpop.f32.mrb[9].mxu1 }
 0x290   : > { %v985_v27 = vmax.f32 %v977_v16, %v984_v22  ;;  %v982_v49 = vsel %vm973_vm2, %v893_v47, -inf }
 0x291   : > { %v983_v28 = vmax.f32 %v976_v48, %v982_v49 }
 0x293   : > { %v987_v29 = vmax.f32 %v983_v28, %v985_v27 }
 0x295   : > { %v988_v52 = vmax.f32 %v986_v46, %v987_v29 }
 0x296   : > { %v969_v35 = vpop.f32.mrb[10].mxu1 }
 0x297   : > { %v989_v53 = vrot.slane %v988_v52, 4  ;;  %v1719_v41 = vpop.f32.mrb[11].mxu1 }
 0x299   : > { %v990_v56 = vmax.f32 %v988_v52, %v989_v53 }
 0x29b   : > { %v991_v54 = vrot.slane %v990_v56, 2 }
 0x29d   : > { %v992_v58 = vmax.f32 %v990_v56, %v991_v54 }
 0x29f   : > { %v993_v59 = vrot.slane %v992_v58, 1 }
 0x2a1   : > { %v994_v61 = vmax.f32 %v992_v58, %v993_v59 }
 0x2a3   : > { %v995_v63 = vmax.f32 %v994_v61, %v969_v35 }
 0x2a5   : > { %v999_v2 = vrot.slane %v995_v63, %v2671_v23  ;;  %v1024_v4 = vsub.f32 %v969_v35, %v995_v63 }
 0x2a7   : > { %v1000_v6 = vsub.f32 %v863_v21, %v999_v2  ;;  %v1001_v8 = vsub.f32 %v1675_v18, %v999_v2  ;;  %v1002_v9 = vsub.f32 %v873_v36, %v999_v2  ;;  %v1003_v12 = vsub.f32 %v1678_v34, %v999_v2 }
 0x2a8   : > { %v1004_v13 = vsub.f32 %v883_v40, %v999_v2  ;;  %v1005_v15 = vsub.f32 %v1681_v37, %v999_v2  ;;  %v1006_v17 = vsub.f32 %v893_v47, %v999_v2  ;;  %v1007_v19 = vsub.f32 %v1684_v10, %v999_v2 }
 0x2a9   : > { %v1008_v20 = vmul.f32 1.442695, %v1000_v6  ;;  %v1010_v25 = vmul.f32 1.442695, %v1001_v8  ;;  %v1012_v26 = vmul.f32 1.442695, %v1002_v9 }
 0x2aa   : > { %v1014_v30 = vmul.f32 1.442695, %v1003_v12  ;;  %v1016_v31 = vmul.f32 1.442695, %v1004_v13  ;;  %v1018_v32 = vmul.f32 1.442695, %v1005_v15 }
 0x2ab   : > { %2029 = vpow2.f32 %v1008_v20  ;;  %v1020_v11 = vmul.f32 1.442695, %v1006_v17  ;;  %v1022_v18 = vmul.f32 1.442695, %v1007_v19  ;;  %v1025_v52 = vmul.f32 1.442695, %v1024_v4 }
 0x2ac   : > { %2031 = vpow2.f32 %v1010_v25 }
 0x2ad   : > { %2033 = vpow2.f32 %v1012_v26  ;;  %v1295_v26 = vld [vmem:[#allocation8 + $0x8] sm:$0xff] }
 0x2ae   : > { %2035 = vpow2.f32 %v1014_v30 }
 0x2af   : > { %2037 = vpow2.f32 %v1016_v31  ;;  %v1297_v31 = vld [vmem:[#allocation8 + $0x18] sm:$0xff] }
 0x2b0   : > { %2039 = vpow2.f32 %v1018_v32 }
 0x2b1   : > { %2041 = vpow2.f32 %v1020_v11  ;;  %v1298_v11 = vld [vmem:[#allocation8 + $0x20] sm:$0xff] }
 0x2b2   : > { %2043 = vpow2.f32 %v1022_v18  ;;  %v1299_v18 = vld [vmem:[#allocation8 + $0x28] sm:$0xff] }
 0x2b3   : > { %2045 = vpow2.f32 %v1025_v52 }
 0x2b5   : > { %v2030_v21 = vpop.eup %2029 }
 0x2b6   : > { %v2032_v34 = vpop.eup %2031  ;;  %v1027_v36 = vsel %vm973_vm2, %v2030_v21, 0.0 }
 0x2b7   : > { %v2034_v37 = vpop.eup %2033  ;;  %v1028_v38 = vsel %vm973_vm2, %v2032_v34, 0.0 }
 0x2b8   : > { %v2036_v39 = vpop.eup %2035  ;;  %v1029_v40 = vadd.f32 %v1028_v38, %v1027_v36  ;;  %v1030_v43 = vsel %vm973_vm2, %v2034_v37, 0.0  ;;  %v1303_v38 = vld [vmem:[#allocation8 + $0x48] sm:$0xff] }
 0x2b9   : > { %v2038_v44 = vpop.eup %2037  ;;  %v1032_v5 = vsel %vm973_vm2, %v2036_v39, 0.0 }
 0x2ba   : > { %v1031_v42 = vadd.f32 %v1030_v43, %v1029_v40  ;;  %v2040_v46 = vpop.eup %2039  ;;  %v1034_v16 = vsel %vm973_vm2, %v2038_v44, 0.0  ;;  %v1304_v40 = vld [vmem:[#allocation8 + $0x50] sm:$0xff]  ;;  %v1305_v43 = vld [vmem:[#allocation8 + $0x58] sm:$0xff] }
 0x2bb   : > { %v2042_v22 = vpop.eup %2041  ;;  %v1036_v48 = vsel %vm973_vm2, %v2040_v46, 0.0 }
 0x2bc   : > { %v1033_v10 = vadd.f32 %v1032_v5, %v1031_v42  ;;  %v2044_v27 = vpop.eup %2043  ;;  %v1038_v28 = vsel %vm973_vm2, %v2042_v22, 0.0  ;;  %v1306_v42 = vld [vmem:[#allocation8 + $0x60] sm:$0xff]  ;;  %v1307_v5 = vld [vmem:[#allocation8 + $0x68] sm:$0xff] }
 0x2bd   : > { %v1040_v35 = vsel %vm973_vm2, %v2044_v27, 0.0  ;;  %v2046_v63 = vpop.eup %2045 }
 0x2be   : > { %v1035_v47 = vadd.f32 %v1034_v16, %v1033_v10  ;;  %v1308_v10 = vld [vmem:[#allocation8 + $0x70] sm:$0xff]  ;;  %v1309_v16 = vld [vmem:[#allocation8 + $0x78] sm:$0xff] }
 0x2c0   : > { %v1037_v49 = vadd.f32 %v1036_v48, %v1035_v47 }
 0x2c2   : > { %v1039_v29 = vadd.f32 %v1038_v28, %v1037_v49 }
 0x2c4   : > { %v1041_v53 = vadd.f32 %v1040_v35, %v1039_v29 }
 0x2c6   : > { %v1042_v41 = vrot.slane %v1041_v53, 4 }
 0x2c8   : > { %v1043_v56 = vadd.f32 %v1042_v41, %v1041_v53  ;;  %v488_v41 = vsub.s32 2, %v2576_v55 }
 0x2ca   : > { %v1044_v54 = vrot.slane %v1043_v56, 2 }
 0x2cc   : > { %v1045_v58 = vadd.f32 %v1044_v54, %v1043_v56 }
 0x2ce   : > { %v1046_v59 = vrot.slane %v1045_v58, 1 }
 0x2d0   : > { %v1047_v61 = vadd.f32 %v1046_v59, %v1045_v58 }
 0x2d2   : > { %v1048_v2 = vadd.f32 %v2046_v63, %v1047_v61  ;;  %v489_v61 = vrot.slane %v2676_v24, %v488_v41 }
 0x2d4   : > { %2047 = vrcp.f32 %v1048_v2  ;;  %v631_v55 = vadd.f32 %v2727_v57, %v489_v61 }
 0x2de   : > { %v2048_v6 = vpop.eup %2047 }
 0x2df   : > { %v1054_v8 = vrot.slane %v2048_v6, %v2671_v23  ;;  %v1063_v9 = vmul.f32 %v2048_v6, %v2046_v63  ;;  %v1294_v23 = vld [vmem:[#allocation8] sm:$0xff] }
 0x2e0   : > { %v1919_v30 = vpack.c.bf16 %v1295_v26, %v1294_v23 }
 0x2e1   : > { %v1055_v12 = vmul.f32 %v2030_v21, %v1054_v8  ;;  %v1056_v13 = vmul.f32 %v2032_v34, %v1054_v8  ;;  %v1057_v4 = vmul.f32 %v2034_v37, %v1054_v8  ;;  %v1058_v15 = vmul.f32 %v2036_v39, %v1054_v8  ;;  %v1301_v34 = vld [vmem:[#allocation8 + $0x38] sm:$0xff]  ;;  %v1302_v37 = vld [vmem:[#allocation8 + $0x40] sm:$0xff] }
 0x2e2   : > { %v1059_v17 = vmul.f32 %v2038_v44, %v1054_v8  ;;  %v1060_v19 = vmul.f32 %v2040_v46, %v1054_v8  ;;  %v1061_v20 = vmul.f32 %v2042_v22, %v1054_v8  ;;  %v1062_v25 = vmul.f32 %v2044_v27, %v1054_v8  ;;  %1920 = vmatpush3.bf16.msra.mxu0 %v1919_v30 }
 0x2e3   : > { %1722 = vmatprep.mubr.msk.f32.mxu1 %vm973_vm2, %v1055_v12  ;;  %1921 = vmatprep.subr.bf16.mxu0 %v2246_v1  ;;  %v1925_v21 = vpack.c.bf16 %v1299_v18, %v1298_v11  ;;  %v1931_v39 = vpack.c.bf16 %v1303_v38, %v1302_v37  ;;  %v1934_v44 = vpack.c.bf16 %v1305_v43, %v1304_v40 }
 0x2e4   : > { %1723 = vmatmul.mubr.msk.f32.vlgmr.msra.gmra.mrb[12].mxu1 %vm973_vm2, %v1056_v13  ;;  %v1937_v46 = vpack.c.bf16 %v1307_v5, %v1306_v42  ;;  %v1940_v22 = vpack.c.bf16 %v1309_v16, %v1308_v10 }
 0x2e5   : > { %1725 = vmatprep.mubr.msk.f32.mxu1 %vm973_vm2, %v1057_v4  ;;  %1735 = vmatpush3.msk.msra.mxu1 %vm1089_vm1, %v2732_v14  ;;  %v1296_v14 = vld [vmem:[#allocation8 + $0x10] sm:$0xff] }
 0x2e6   : > { %v1922_v32 = vpack.c.bf16 %v1297_v31, %v1296_v14 }
 0x2e8   : > { %1726 = vmatmul.mubr.msk.f32.gmra.mrb[14].mxu1 %vm973_vm2, %v1058_v15  ;;  %1923 = vmatpush3.bf16.msra.mxu0 %v1922_v32 }
 0x2e9   : > { %1728 = vmatprep.mubr.msk.f32.mxu1 %vm973_vm2, %v1059_v17  ;;  %1924 = vmatprep.subr.bf16.mxu0 %v2246_v1 }
 0x2ec   : > { %1729 = vmatmul.mubr.msk.f32.gmra.mrb[16].mxu1 %vm973_vm2, %v1060_v19  ;;  %1926 = vmatpush3.bf16.msra.mxu0 %v1925_v21 }
 0x2ed   : > { %1731 = vmatprep.mubr.msk.f32.mxu1 %vm973_vm2, %v1061_v20  ;;  %1927 = vmatprep.subr.bf16.mxu0 %v2246_v1 }
 0x2f0   : > { %1732 = vmatmul.mubr.msk.f32.gmra.mrb[18].mxu1 %vm973_vm2, %v1062_v25 }
 0x2f1   : > { %1736 = vmatprep.mubr.msk.f32.mxu1 %vm2247_vm0, %v2245_v0  ;;  %v1300_v0 = vld [vmem:[#allocation8 + $0x30] sm:$0xff] }
 0x2f2   : > { %v1928_v36 = vpack.c.bf16 %v1301_v34, %v1300_v0 }
 0x2f4   : > { %1737 = vmatmul.mubr.msk.f32.vlgmr.msra.gmra.mrb[20].mxu1 %vm973_vm2, %v1063_v9  ;;  %1929 = vmatpush3.bf16.msra.mxu0 %v1928_v36 }
 0x2f5   : > { %1930 = vmatprep.subr.bf16.mxu0 %v2246_v1 }
 0x2f8   : > { %1932 = vmatpush3.bf16.msra.mxu0 %v1931_v39 }
 0x2f9   : > { %1933 = vmatprep.subr.bf16.mxu0 %v2246_v1 }
 0x2fc   : > { %1935 = vmatpush3.bf16.msra.mxu0 %v1934_v44 }
 0x2fd   : > { %1936 = vmatprep.subr.bf16.mxu0 %v2246_v1 }
 0x300   : > { %1938 = vmatpush3.bf16.msra.mxu0 %v1937_v46 }
 0x301   : > { %1939 = vmatprep.subr.bf16.mxu0 %v2246_v1 }
 0x304   : > { %1941 = vmatpush3.bf16.msra.mxu0 %v1940_v22 }
 0x3b7   : > { %v1724_v47 = vpop.f32.mrb[12].mxu1 }
 0x3b8   : > { %v1272_v48 = vmul.f32 %v1724_v47, %v2689_v33  ;;  %v1159_v27 = vpop.f32.mrb[13].mxu1 }
 0x3b9   : > { %v1271_v49 = vmul.f32 %v1159_v27, %v2685_v45 }
 0x3bb   : > { %v1279_v28 = vadd.f32 %v1272_v48, %v1271_v49  ;;  %v1727_v29 = vpop.f32.mrb[14].mxu1 }
 0x3bc   : > { %v1274_v52 = vmul.f32 %v1727_v29, %v2697_v50  ;;  %v1169_v35 = vpop.f32.mrb[15].mxu1 }
 0x3bd   : > { %v1273_v53 = vmul.f32 %v1169_v35, %v2692_v51 }
 0x3bf   : > { %v1280_v56 = vadd.f32 %v1279_v28, %v1273_v53  ;;  %v1730_v54 = vpop.f32.mrb[16].mxu1 }
 0x3c0   : > { %v1276_v1 = vmul.f32 %v1730_v54, %v2707_v62  ;;  %v1179_v58 = vpop.f32.mrb[17].mxu1 }
 0x3c1   : > { %v1275_v59 = vmul.f32 %v1179_v58, %v2702_v60  ;;  %v1281_v33 = vadd.f32 %v1280_v56, %v1274_v52 }
 0x3c3   : > { %v1282_v45 = vadd.f32 %v1281_v33, %v1275_v59  ;;  %v1733_v63 = vpop.f32.mrb[18].mxu1 }
 0x3c4   : > { %v1278_v2 = vmul.f32 %v1733_v63, %v2717_v7  ;;  %v1189_v50 = vpop.f32.mrb[19].mxu1 }
 0x3c5   : > { %v1277_v6 = vmul.f32 %v1189_v50, %v2712_v3  ;;  %v1283_v51 = vadd.f32 %v1282_v45, %v1276_v1  ;;  %v1310_v3 = vld [vmem:[%s2844_s6] sm:$0x1] }
 0x3c7   : > { %v1284_v8 = vadd.f32 %v1283_v51, %v1277_v6  ;;  %v1267_v62 = vpop.f32.mrb[20].mxu1 }
 0x3c8   : > { %v1292_v9 = vmul.f32 %v1267_v62, %v631_v55  ;;  %v1738_v12 = vpop.f32.mrb[21].mxu1 }
 0x3c9   : > { %v1285_v60 = vadd.f32 %v1284_v8, %v1278_v2 }
 0x3cb   : > { %v1286_v13 = vrot.slane %v1285_v60, 4 }
 0x3cd   : > { %v1287_v4 = vadd.f32 %v1286_v13, %v1285_v60 }
 0x3cf   : > { %v1288_v24 = vrot.slane %v1287_v4, 2 }
 0x3d1   : > { %v1289_v15 = vadd.f32 %v1288_v24, %v1287_v4 }
 0x3d3   : > { %v1290_v17 = vrot.slane %v1289_v15, 1 }
 0x3d5   : > { %v1291_v19 = vadd.f32 %v1290_v17, %v1289_v15 }
 0x3d7   : > { %v1293_v7 = vadd.f32 %v1292_v9, %v1291_v19 }
 0x3d9   : > { %1772 = vmatmul.mubr.f32.vlgmr.msra.gmra.mrb[18].mxu0 %v1293_v7 }
 0x4ac   : > { %v1377_v57 = vpop.f32.mrb[18].mxu0 }
 0x4ad   : > { %v1378_v20 = vadd.f32 %v1377_v57, %v1310_v3  ;;  %v1773_v25 = vpop.f32.mrb[19].mxu0 }
 0x4af   : > { %1381 = vst [vmem:[%s381_s26] sm:$0x1] %v1378_v20 }
 0x4b0   : > { %2174 = shalt.err (!%p2171_p0)
}
 0x4b1   : > { %s2175_s17 = scalar_lea.hbm %s2796_s18, 16  ;;  %s2179_s27 = scalar_lea.hbm %s2847_s9, 32 }
 0x4b2   : > { %p2176_p10 = scmp.ne.s32.totalorder %s2796_s18, %s2175_s17  ;;  %p2180_p4 = scmp.lt.u32.totalorder %s2796_s18, %s2847_s9 }
 0x4b3   : > { %p2181_p12 = scmp.lt.u32.totalorder %s2179_s27, %s2175_s17  ;;  %p2183_p8 = scmp.lt.u32.totalorder %s2175_s17, %s2796_s18 }
 0x4b4   : > { %p2177_p2 = pnand %p2176_p10, %p2877_p11 }
 0x4b5   : > { %p2182_p7 = por %p2181_p12, %p2180_p4 }
 0x4b6   : > { %p2178_p3 = pneg %p2177_p2 }
 0x4b7   : > { %p2184_p13 = por %p2183_p8, %p2182_p7 }
 0x4b9   : > { %p2185_p1 = pnand %p2184_p13, %p2178_p3 }
 0x4bb   : > { %2188 = shalt.err (!%p2185_p1)
}
 0x4bc   : > { %1958 = dma.vmem_to_hbm [thread:$0]  (%p2877_p11), %s2798_s30, 16, %s2796_s18, %s1383_s21  }
 0x4bd PF: > { %s2878_s11 = sld [smem:[#allocation15_spill]]  ;;  %s2879_s28 = sld [smem:[#allocation19_spill]] }
 0x4be   : > { %p1985_p6 = scmp.ge.s32.totalorder %s2235_s12, 2 }
 0x4c3   : > { %s1407_s26 = sand.u32 1, %s2878_s11   ;;  %p2880_p9 = scmp.ne.s32.totalorder %s2879_s28, 0 }
 0x4c4   : > { %s1408_s14 = scalar_lea.sflag [#allocation4], %s1407_s26 }
 0x4c5   : > { %p1974_p5 = pnand %p1985_p6, %p2880_p9 }
 0x4c7   : > { %2218 = dma.done.wait (!%p1974_p5), %s1408_s14, 16  }
 0x4c8   : > { %2220 = vsyncadd (!%p1974_p5), %s1408_s14, 4294967280  ;;  %s2881_s12 = sld [smem:[#allocation17_spill]]  ;;  %s2882_s16 = sld [smem:[#allocation16_spill]] }
 0x4c9   : > { %s2883_s11 = sld [smem:[#allocation18_spill]]  ;;  %s2884_s30 = smov %s2227_s10 }
 0x4ce   : > { %p22_p0 = scmp.ge.s32.totalorder %s2881_s12, 4   ;;  %s2885_s10 = smov %s2882_s16 }
 0x4d0   :  { %24 = sbr.rel (!%p22_p0) target bundleno = 6 (0x6), region = 108 }
 0x4d7   :  { %1412 = vsyncpa [#allocation3], 1 }
 0x4d8   :  { %1414 = vsyncpa [#allocation3 + $0x1], 1 }
 0x4d9   :  { %1415 = vsyncpa [#allocation6], 1 }
 0x4da   :  { %1416 = vsyncpa [#allocation9], 1 }
 0x4db   :  { %1417 = vsyncpa [#allocation4], 1 }
 0x4dc   :  { %1419 = vsyncpa [#allocation4 + $0x1], 1 }

</bundles_post_ra>
